<compile_context>
chip_gen: v7x
topology: tpu7x:2x2x1
jax: 0.10.0
libtpu: 0.0.40
codegen_flags: <defaults>
</compile_context>

<pallas_src>
import functools

import jax
import jax.numpy as jnp
from jax.experimental import pallas as pl
from jax.experimental.pallas import tpu as pltpu

NEG_SLOPE = 0.01  # torch.nn.LeakyReLU default negative_slope


# --------------------------------------------------------------------------------------
# Fused kernel: TransformerConv -> LeakyReLU -> TransformerConv -> LeakyReLU -> Linear
# --------------------------------------------------------------------------------------
def ppn_fused_kernel(c1, c2, e_dim,
                     x_ref, ef_ref, mask_ref,
                     wf1_ref, aux1_ref, wf2_ref, aux2_ref, head_ref,
                     out_ref):
    # Loaded once, reused by both layers.
    x = x_ref[...]                               # [N, Fin]          f32
    ef = ef_ref[...].astype(jnp.float32)         # [N, N, E] (tgt, src, E), DMA'd as bf16
    mask = mask_ref[...]                         # [N, N]  1.0 where edge exists

    def layer(h, wf_ref, aux_ref, c):
        # aux layout (f32): row 0        -> fused bias [1, 4C+E]
        #                   rows 1..E    -> we  [E, C]   (lin_edge weight)
        #                   row  1+E     -> wba [1, C]   (folded beta weight for agg)
        #                   row  2+E     -> wbr [1, C]   (folded beta weight for x_r)
        aux = aux_ref[...]
        bias = aux[0:1, :]
        we = aux[1:1 + e_dim, 0:c]
        wba = aux[1 + e_dim:2 + e_dim, 0:c]
        wbr = aux[2 + e_dim:3 + e_dim, 0:c]

        # ONE fused projection matmul: [q | k | v | x_r | qe] = h @ W_fused + b_fused
        hb = h.astype(jnp.bfloat16)
        fused = (jnp.dot(hb, wf_ref[...], preferred_element_type=jnp.float32) + bias)
        q = fused[:, 0:c]                        # [N, C]
        k = fused[:, c:2 * c]                    # [N, C]
        v = fused[:, 2 * c:3 * c]                # [N, C]
        x_r = fused[:, 3 * c:4 * c]              # [N, C]  (lin_skip)
        qe = fused[:, 4 * c:4 * c + e_dim]       # [N, E]  (= q @ we.T, pre-folded)

        scale = jnp.float32(1.0 / (c ** 0.5))

        # score: s[i, j] = q_i . (k_j + we.T @ e_ij)   (no [N,N,C] intermediate)
        s = jnp.dot(q, k.T, preferred_element_type=jnp.float32)          # [N, N]
        s = (s + jnp.sum(ef * qe[:, None, :], axis=-1)) * scale

        # masked softmax over source nodes j; mask multiplies after exp, so the
        # (unmasked) max-subtraction cancels — no additive -1e9 bias needed.
        m = jnp.max(s, axis=1, keepdims=True)
        p = jnp.exp(s - m) * mask
        denom = jnp.sum(p, axis=1, keepdims=True)
        alpha = p * pl.reciprocal(jnp.maximum(denom, 1e-20), approx=True)  # [N, N]

        # aggregation: alpha @ v  +  (sum_j alpha[i,j]*ef[i,j,:]) @ we
        edge_agg = jnp.sum(alpha[:, :, None] * ef, axis=1)                 # [N, E]
        agg = (jnp.dot(alpha, v, preferred_element_type=jnp.float32)
               + jnp.dot(edge_agg, we, preferred_element_type=jnp.float32))  # [N, C]

        # root/skip connection with beta gate (lin_beta pre-folded; VPU, no MXU)
        beta_logit = jnp.sum(agg * wba + x_r * wbr, axis=-1, keepdims=True)  # [N, 1]
        beta = jax.nn.sigmoid(beta_logit)
        out = beta * x_r + (1.0 - beta) * agg
        # LeakyReLU
        return jnp.where(out >= 0.0, out, NEG_SLOPE * out)

    x1 = layer(x, wf1_ref, aux1_ref, c1)
    x2 = layer(x1, wf2_ref, aux2_ref, c2)

    # MLP head on concat([x1, x2]) expressed as split weights (no lane-axis concat).
    head = head_ref[...]                          # [h0+h1+1, n_out] f32 (last row = bias)
    w1 = head[0:c1, :]
    w2 = head[c1:c1 + c2, :]
    b = head[c1 + c2:c1 + c2 + 1, :]
    out_ref[...] = (jnp.dot(x1, w1, preferred_element_type=jnp.float32)
                    + jnp.dot(x2, w2, preferred_element_type=jnp.float32)
                    + b)


# --------------------------------------------------------------------------------------
# Host-side glue
# --------------------------------------------------------------------------------------
def _vmem_spec():
    return pl.BlockSpec(memory_space=pltpu.MemorySpace.VMEM)


def densify_edges(edge_index, edge_atts, n_nodes):
    """edge_index: [2, num_edges] (row0=source, row1=target, PyG convention).

    Built directly in bf16 (largest O(N^2*E) tensor).  Duplicate (parallel) edges
    collapse to the last one written; PyG softmaxes each parallel edge separately,
    so results diverge for multigraphs.
    """
    src = edge_index[0]
    tgt = edge_index[1]
    e_dim = edge_atts.shape[1]
    mask = jnp.zeros((n_nodes, n_nodes), jnp.float32).at[tgt, src].set(1.0)
    ef_dense = jnp.zeros((n_nodes, n_nodes, e_dim), jnp.bfloat16).at[tgt, src].set(
        edge_atts.astype(jnp.bfloat16))
    return ef_dense, mask


def fold_layer_params(t):
    """Module-style TransformerConv params -> (W_fused bf16 [Fin,4C+E], aux f32 [3+E,4C+E])."""
    c = t["wq"].shape[1]
    e = t["we"].shape[0]
    we = t["we"]                                                           # [E, C]
    # Fused projection: [q | k | v | x_r | qe] where qe = (x@wq + bq) @ we.T pre-factored.
    w_fused = jnp.concatenate(
        [t["wq"], t["wk"], t["wv"], t["wskip"], t["wq"] @ we.T], axis=1)   # [Fin, 4C+E]
    b_fused = jnp.concatenate(
        [t["bq"], t["bk"], t["bv"], t["bskip"], t["bq"] @ we.T], axis=1)   # [1, 4C+E]
    # lin_beta on cat([agg, x_r, agg - x_r]) folded to two [1,C] rows.
    w1, w2, w3 = t["wbeta"][:c], t["wbeta"][c:2 * c], t["wbeta"][2 * c:]
    wba = (w1 + w3).T                                                      # [1, C]
    wbr = (w2 - w3).T                                                      # [1, C]

    width = 4 * c + e
    aux = jnp.zeros((3 + e, width), jnp.float32)
    aux = aux.at[0:1, :].set(b_fused)
    aux = aux.at[1:1 + e, 0:c].set(we)
    aux = aux.at[1 + e:2 + e, 0:c].set(wba)
    aux = aux.at[2 + e:3 + e, 0:c].set(wbr)
    return w_fused.astype(jnp.bfloat16), aux


def fold_params(params):
    wf1, aux1 = fold_layer_params(params["t1"])
    wf2, aux2 = fold_layer_params(params["t2"])
    head = jnp.concatenate([params["w_mlp"], params["b_mlp"]], axis=0)     # [h0+h1+1, n_out]
    return wf1, aux1, wf2, aux2, head.astype(jnp.float32)


@jax.jit
def ppn_forward(params, x_in, edge_index, edge_atts):
    n = x_in.shape[0]
    n_out = params["w_mlp"].shape[1]
    c1 = params["t1"]["wq"].shape[1]
    c2 = params["t2"]["wq"].shape[1]
    e_dim = params["t1"]["we"].shape[0]

    ef_dense, mask = densify_edges(edge_index, edge_atts, n)
    args = (x_in, ef_dense, mask) + fold_params(params)

    kernel = functools.partial(ppn_fused_kernel, c1, c2, e_dim)
    return pl.pallas_call(
        kernel,
        out_shape=jax.ShapeDtypeStruct((n, n_out), jnp.float32),
        in_specs=[_vmem_spec() for _ in args],
        out_specs=_vmem_spec(),
    )(*args)


# --------------------------------------------------------------------------------------
# Module-style parameter init (mirrors the PyTorch layers)
# --------------------------------------------------------------------------------------
def init_transformer_params(key, f_in, c, e_dim):
    ks = jax.random.split(key, 6)
    s = 0.1
    return dict(
        wq=s * jax.random.normal(ks[0], (f_in, c), jnp.float32),
        bq=jnp.zeros((1, c), jnp.float32),
        wk=s * jax.random.normal(ks[1], (f_in, c), jnp.float32),
        bk=jnp.zeros((1, c), jnp.float32),
        wv=s * jax.random.normal(ks[2], (f_in, c), jnp.float32),
        bv=jnp.zeros((1, c), jnp.float32),
        we=s * jax.random.normal(ks[3], (e_dim, c), jnp.float32),      # lin_edge (no bias)
        wskip=s * jax.random.normal(ks[4], (f_in, c), jnp.float32),
        bskip=jnp.zeros((1, c), jnp.float32),
        wbeta=s * jax.random.normal(ks[5], (3 * c, 1), jnp.float32),   # lin_beta (no bias)
    )


def init_ppn_params(key, n_node_features, n_out_classes, n_edge_features, hidden_layers):
    k1, k2, k3 = jax.random.split(key, 3)
    h0, h1 = hidden_layers
    return dict(
        t1=init_transformer_params(k1, n_node_features, h0, n_edge_features),
        t2=init_transformer_params(k2, h0, h1, n_edge_features),
        w_mlp=0.1 * jax.random.normal(k3, (h0 + h1, n_out_classes), jnp.float32),
        b_mlp=jnp.zeros((1, n_out_classes), jnp.float32),
    )


# --------------------------------------------------------------------------------------
if __name__ == "__main__":
    key = jax.random.PRNGKey(0)
    k_param, k_x, k_e = jax.random.split(key, 3)

    N_NODES = 8
    N_NODE_FEATURES = 16
    N_EDGE_FEATURES = 8
    HIDDEN_LAYERS = (32, 16)
    N_OUT_CLASSES = 4

    params = init_ppn_params(k_param, N_NODE_FEATURES, N_OUT_CLASSES,
                             N_EDGE_FEATURES, HIDDEN_LAYERS)

    # node features
    x_in = jax.random.normal(k_x, (N_NODES, N_NODE_FEATURES), jnp.float32)

    # deterministic directed graph: j -> (j+1)%N and j -> (j+3)%N  (every node has in-edges)
    src = jnp.array([j for j in range(N_NODES)] * 2, dtype=jnp.int32)
    tgt = jnp.array([(j + 1) % N_NODES for j in range(N_NODES)]
                    + [(j + 3) % N_NODES for j in range(N_NODES)], dtype=jnp.int32)
    edge_index = jnp.stack([src, tgt], axis=0)                     # [2, 16]
    edge_atts = jax.random.normal(k_e, (edge_index.shape[1], N_EDGE_FEATURES), jnp.float32)

    out = ppn_forward(params, x_in, edge_index, edge_atts)
    out = jax.block_until_ready(out)
    assert out.shape == (N_NODES, N_OUT_CLASSES)
    assert bool(jnp.all(jnp.isfinite(out)))
    print("KERNEL_OK")
</pallas_src>

<mosaic_0001>
module attributes {stable_mosaic.version = 11 : i64} {
  func.func @ppn_fused_kernel(%arg0: memref<8x16xf32, #tpu.memory_space<vmem>>, %arg1: memref<8x8x8xbf16, #tpu.memory_space<vmem>>, %arg2: memref<8x8xf32, #tpu.memory_space<vmem>>, %arg3: memref<16x136xbf16, #tpu.memory_space<vmem>>, %arg4: memref<11x136xf32, #tpu.memory_space<vmem>>, %arg5: memref<32x72xbf16, #tpu.memory_space<vmem>>, %arg6: memref<11x72xf32, #tpu.memory_space<vmem>>, %arg7: memref<49x4xf32, #tpu.memory_space<vmem>>, %arg8: memref<8x4xf32, #tpu.memory_space<vmem>>) attributes {dimension_semantics = [], scalar_prefetch = 0 : i64, scratch_operands = 0 : i64, tpu.core_type = #tpu.core_type<tc>} {
    %c0 = arith.constant 0 : index
    %c0_0 = arith.constant 0 : index
    %0 = vector.load %arg0[%c0, %c0_0] : memref<8x16xf32, #tpu.memory_space<vmem>>, vector<8x16xf32>
    %c0_1 = arith.constant 0 : index
    %c0_2 = arith.constant 0 : index
    %c0_3 = arith.constant 0 : index
    %1 = vector.load %arg1[%c0_1, %c0_2, %c0_3] : memref<8x8x8xbf16, #tpu.memory_space<vmem>>, vector<8x8x8xbf16>
    %2 = arith.extf %1 : vector<8x8x8xbf16> to vector<8x8x8xf32>
    %c0_4 = arith.constant 0 : index
    %c0_5 = arith.constant 0 : index
    %3 = vector.load %arg2[%c0_4, %c0_5] : memref<8x8xf32, #tpu.memory_space<vmem>>, vector<8x8xf32>
    %c0_6 = arith.constant 0 : index
    %c0_7 = arith.constant 0 : index
    %4 = vector.load %arg4[%c0_6, %c0_7] : memref<11x136xf32, #tpu.memory_space<vmem>>, vector<11x136xf32>
    %5 = vector.extract_strided_slice %4 {offsets = [0, 0], sizes = [1, 136], strides = [1, 1]} : vector<11x136xf32> to vector<1x136xf32>
    %6 = vector.extract_strided_slice %4 {offsets = [1, 0], sizes = [8, 32], strides = [1, 1]} : vector<11x136xf32> to vector<8x32xf32>
    %7 = vector.extract_strided_slice %4 {offsets = [9, 0], sizes = [1, 32], strides = [1, 1]} : vector<11x136xf32> to vector<1x32xf32>
    %8 = vector.extract_strided_slice %4 {offsets = [10, 0], sizes = [1, 32], strides = [1, 1]} : vector<11x136xf32> to vector<1x32xf32>
    %9 = arith.truncf %0 : vector<8x16xf32> to vector<8x16xbf16>
    %c0_8 = arith.constant 0 : index
    %c0_9 = arith.constant 0 : index
    %10 = vector.load %arg3[%c0_8, %c0_9] : memref<16x136xbf16, #tpu.memory_space<vmem>>, vector<16x136xbf16>
    %cst = arith.constant dense<0.000000e+00> : vector<8x136xf32>
    %11 = tpu.matmul %9, %10, %cst {dimension_numbers = #tpu.dot_dimension_numbers<[1], [0], [0], [1], [0, 0, 1, 1], [], []>} : vector<8x16xbf16>, vector<16x136xbf16>, vector<8x136xf32> -> vector<8x136xf32>
    %12 = vector.broadcast %5 : vector<1x136xf32> to vector<8x136xf32>
    %13 = arith.addf %11, %12 : vector<8x136xf32>
    %14 = vector.extract_strided_slice %13 {offsets = [0, 0], sizes = [8, 32], strides = [1, 1]} : vector<8x136xf32> to vector<8x32xf32>
    %15 = vector.extract_strided_slice %13 {offsets = [0, 32], sizes = [8, 32], strides = [1, 1]} : vector<8x136xf32> to vector<8x32xf32>
    %16 = vector.extract_strided_slice %13 {offsets = [0, 64], sizes = [8, 32], strides = [1, 1]} : vector<8x136xf32> to vector<8x32xf32>
    %17 = vector.extract_strided_slice %13 {offsets = [0, 96], sizes = [8, 32], strides = [1, 1]} : vector<8x136xf32> to vector<8x32xf32>
    %18 = vector.extract_strided_slice %13 {offsets = [0, 128], sizes = [8, 8], strides = [1, 1]} : vector<8x136xf32> to vector<8x8xf32>
    %19 = tpu.transpose %15, [1, 0] : vector<8x32xf32> -> vector<32x8xf32>
    %cst_10 = arith.constant dense<0.000000e+00> : vector<8x8xf32>
    %20 = tpu.matmul %14, %19, %cst_10 {dimension_numbers = #tpu.dot_dimension_numbers<[1], [0], [0], [1], [0, 0, 1, 1], [], []>} : vector<8x32xf32>, vector<32x8xf32>, vector<8x8xf32> -> vector<8x8xf32>
    %21 = vector.shape_cast %18 : vector<8x8xf32> to vector<8x1x8xf32>
    %22 = vector.broadcast %21 : vector<8x1x8xf32> to vector<8x8x8xf32>
    %23 = arith.mulf %2, %22 : vector<8x8x8xf32>
    %cst_11 = arith.constant dense<0.000000e+00> : vector<8x8xf32>
    %24 = vector.multi_reduction <add>, %23, %cst_11 [2] : vector<8x8x8xf32> to vector<8x8xf32>
    %25 = arith.addf %20, %24 : vector<8x8xf32>
    %cst_12 = arith.constant 0.176776692 : f32
    %26 = vector.broadcast %cst_12 : f32 to vector<8x8xf32>
    %27 = arith.mulf %25, %26 : vector<8x8xf32>
    %cst_13 = arith.constant dense<0xFF800000> : vector<8xf32>
    %28 = vector.multi_reduction <maximumf>, %27, %cst_13 [1] : vector<8x8xf32> to vector<8xf32>
    %29 = vector.shape_cast %28 : vector<8xf32> to vector<8x1xf32>
    %30 = vector.broadcast %29 : vector<8x1xf32> to vector<8x8xf32>
    %31 = arith.subf %27, %30 : vector<8x8xf32>
    %32 = math.exp %31 : vector<8x8xf32>
    %33 = arith.mulf %32, %3 : vector<8x8xf32>
    %cst_14 = arith.constant dense<0.000000e+00> : vector<8xf32>
    %34 = vector.multi_reduction <add>, %33, %cst_14 [1] : vector<8x8xf32> to vector<8xf32>
    %35 = vector.shape_cast %34 : vector<8xf32> to vector<8x1xf32>
    %cst_15 = arith.constant 9.99999968E-21 : f32
    %36 = vector.broadcast %cst_15 : f32 to vector<8x1xf32>
    %37 = arith.maximumf %35, %36 : vector<8x1xf32>
    %38 = tpu.reciprocal %37 {approx = true} : vector<8x1xf32> -> vector<8x1xf32>
    %39 = vector.broadcast %38 : vector<8x1xf32> to vector<8x8xf32>
    %40 = arith.mulf %33, %39 : vector<8x8xf32>
    %41 = vector.shape_cast %40 : vector<8x8xf32> to vector<8x8x1xf32>
    %42 = vector.broadcast %41 : vector<8x8x1xf32> to vector<8x8x8xf32>
    %43 = arith.mulf %42, %2 : vector<8x8x8xf32>
    %cst_16 = arith.constant dense<0.000000e+00> : vector<8x8xf32>
    %44 = vector.multi_reduction <add>, %43, %cst_16 [1] : vector<8x8x8xf32> to vector<8x8xf32>
    %cst_17 = arith.constant dense<0.000000e+00> : vector<8x32xf32>
    %45 = tpu.matmul %40, %16, %cst_17 {dimension_numbers = #tpu.dot_dimension_numbers<[1], [0], [0], [1], [0, 0, 1, 1], [], []>} : vector<8x8xf32>, vector<8x32xf32>, vector<8x32xf32> -> vector<8x32xf32>
    %cst_18 = arith.constant dense<0.000000e+00> : vector<8x32xf32>
    %46 = tpu.matmul %44, %6, %cst_18 {dimension_numbers = #tpu.dot_dimension_numbers<[1], [0], [0], [1], [0, 0, 1, 1], [], []>} : vector<8x8xf32>, vector<8x32xf32>, vector<8x32xf32> -> vector<8x32xf32>
    %47 = arith.addf %45, %46 : vector<8x32xf32>
    %48 = vector.broadcast %7 : vector<1x32xf32> to vector<8x32xf32>
    %49 = arith.mulf %47, %48 : vector<8x32xf32>
    %50 = vector.broadcast %8 : vector<1x32xf32> to vector<8x32xf32>
    %51 = arith.mulf %17, %50 : vector<8x32xf32>
    %52 = arith.addf %49, %51 : vector<8x32xf32>
    %cst_19 = arith.constant dense<0.000000e+00> : vector<8xf32>
    %53 = vector.multi_reduction <add>, %52, %cst_19 [1] : vector<8x32xf32> to vector<8xf32>
    %54 = vector.shape_cast %53 : vector<8xf32> to vector<8x1xf32>
    %55 = arith.negf %54 : vector<8x1xf32>
    %56 = math.exp %55 : vector<8x1xf32>
    %cst_20 = arith.constant 1.000000e+00 : f32
    %57 = vector.broadcast %cst_20 : f32 to vector<8x1xf32>
    %58 = arith.addf %57, %56 : vector<8x1xf32>
    %59 = arith.divf %57, %58 : vector<8x1xf32>
    %60 = vector.broadcast %59 : vector<8x1xf32> to vector<8x32xf32>
    %61 = arith.mulf %60, %17 : vector<8x32xf32>
    %cst_21 = arith.constant 1.000000e+00 : f32
    %62 = vector.broadcast %cst_21 : f32 to vector<8x1xf32>
    %63 = arith.subf %62, %59 : vector<8x1xf32>
    %64 = vector.broadcast %63 : vector<8x1xf32> to vector<8x32xf32>
    %65 = arith.mulf %64, %47 : vector<8x32xf32>
    %66 = arith.addf %61, %65 : vector<8x32xf32>
    %cst_22 = arith.constant 0.000000e+00 : f32
    %67 = vector.broadcast %cst_22 : f32 to vector<8x32xf32>
    %68 = arith.cmpf oge, %66, %67 : vector<8x32xf32>
    %cst_23 = arith.constant 0.00999999977 : f32
    %69 = vector.broadcast %cst_23 : f32 to vector<8x32xf32>
    %70 = arith.mulf %69, %66 : vector<8x32xf32>
    %71 = arith.select %68, %66, %70 : vector<8x32xi1>, vector<8x32xf32>
    %c0_24 = arith.constant 0 : index
    %c0_25 = arith.constant 0 : index
    %72 = vector.load %arg6[%c0_24, %c0_25] : memref<11x72xf32, #tpu.memory_space<vmem>>, vector<11x72xf32>
    %73 = vector.extract_strided_slice %72 {offsets = [0, 0], sizes = [1, 72], strides = [1, 1]} : vector<11x72xf32> to vector<1x72xf32>
    %74 = vector.extract_strided_slice %72 {offsets = [1, 0], sizes = [8, 16], strides = [1, 1]} : vector<11x72xf32> to vector<8x16xf32>
    %75 = vector.extract_strided_slice %72 {offsets = [9, 0], sizes = [1, 16], strides = [1, 1]} : vector<11x72xf32> to vector<1x16xf32>
    %76 = vector.extract_strided_slice %72 {offsets = [10, 0], sizes = [1, 16], strides = [1, 1]} : vector<11x72xf32> to vector<1x16xf32>
    %77 = arith.truncf %71 : vector<8x32xf32> to vector<8x32xbf16>
    %c0_26 = arith.constant 0 : index
    %c0_27 = arith.constant 0 : index
    %78 = vector.load %arg5[%c0_26, %c0_27] : memref<32x72xbf16, #tpu.memory_space<vmem>>, vector<32x72xbf16>
    %cst_28 = arith.constant dense<0.000000e+00> : vector<8x72xf32>
    %79 = tpu.matmul %77, %78, %cst_28 {dimension_numbers = #tpu.dot_dimension_numbers<[1], [0], [0], [1], [0, 0, 1, 1], [], []>} : vector<8x32xbf16>, vector<32x72xbf16>, vector<8x72xf32> -> vector<8x72xf32>
    %80 = vector.broadcast %73 : vector<1x72xf32> to vector<8x72xf32>
    %81 = arith.addf %79, %80 : vector<8x72xf32>
    %82 = vector.extract_strided_slice %81 {offsets = [0, 0], sizes = [8, 16], strides = [1, 1]} : vector<8x72xf32> to vector<8x16xf32>
    %83 = vector.extract_strided_slice %81 {offsets = [0, 16], sizes = [8, 16], strides = [1, 1]} : vector<8x72xf32> to vector<8x16xf32>
    %84 = vector.extract_strided_slice %81 {offsets = [0, 32], sizes = [8, 16], strides = [1, 1]} : vector<8x72xf32> to vector<8x16xf32>
    %85 = vector.extract_strided_slice %81 {offsets = [0, 48], sizes = [8, 16], strides = [1, 1]} : vector<8x72xf32> to vector<8x16xf32>
    %86 = vector.extract_strided_slice %81 {offsets = [0, 64], sizes = [8, 8], strides = [1, 1]} : vector<8x72xf32> to vector<8x8xf32>
    %87 = tpu.transpose %83, [1, 0] : vector<8x16xf32> -> vector<16x8xf32>
    %cst_29 = arith.constant dense<0.000000e+00> : vector<8x8xf32>
    %88 = tpu.matmul %82, %87, %cst_29 {dimension_numbers = #tpu.dot_dimension_numbers<[1], [0], [0], [1], [0, 0, 1, 1], [], []>} : vector<8x16xf32>, vector<16x8xf32>, vector<8x8xf32> -> vector<8x8xf32>
    %89 = vector.shape_cast %86 : vector<8x8xf32> to vector<8x1x8xf32>
    %90 = vector.broadcast %89 : vector<8x1x8xf32> to vector<8x8x8xf32>
    %91 = arith.mulf %2, %90 : vector<8x8x8xf32>
    %cst_30 = arith.constant dense<0.000000e+00> : vector<8x8xf32>
    %92 = vector.multi_reduction <add>, %91, %cst_30 [2] : vector<8x8x8xf32> to vector<8x8xf32>
    %93 = arith.addf %88, %92 : vector<8x8xf32>
    %cst_31 = arith.constant 2.500000e-01 : f32
    %94 = vector.broadcast %cst_31 : f32 to vector<8x8xf32>
    %95 = arith.mulf %93, %94 : vector<8x8xf32>
    %cst_32 = arith.constant dense<0xFF800000> : vector<8xf32>
    %96 = vector.multi_reduction <maximumf>, %95, %cst_32 [1] : vector<8x8xf32> to vector<8xf32>
    %97 = vector.shape_cast %96 : vector<8xf32> to vector<8x1xf32>
    %98 = vector.broadcast %97 : vector<8x1xf32> to vector<8x8xf32>
    %99 = arith.subf %95, %98 : vector<8x8xf32>
    %100 = math.exp %99 : vector<8x8xf32>
    %101 = arith.mulf %100, %3 : vector<8x8xf32>
    %cst_33 = arith.constant dense<0.000000e+00> : vector<8xf32>
    %102 = vector.multi_reduction <add>, %101, %cst_33 [1] : vector<8x8xf32> to vector<8xf32>
    %103 = vector.shape_cast %102 : vector<8xf32> to vector<8x1xf32>
    %cst_34 = arith.constant 9.99999968E-21 : f32
    %104 = vector.broadcast %cst_34 : f32 to vector<8x1xf32>
    %105 = arith.maximumf %103, %104 : vector<8x1xf32>
    %106 = tpu.reciprocal %105 {approx = true} : vector<8x1xf32> -> vector<8x1xf32>
    %107 = vector.broadcast %106 : vector<8x1xf32> to vector<8x8xf32>
    %108 = arith.mulf %101, %107 : vector<8x8xf32>
    %109 = vector.shape_cast %108 : vector<8x8xf32> to vector<8x8x1xf32>
    %110 = vector.broadcast %109 : vector<8x8x1xf32> to vector<8x8x8xf32>
    %111 = arith.mulf %110, %2 : vector<8x8x8xf32>
    %cst_35 = arith.constant dense<0.000000e+00> : vector<8x8xf32>
    %112 = vector.multi_reduction <add>, %111, %cst_35 [1] : vector<8x8x8xf32> to vector<8x8xf32>
    %cst_36 = arith.constant dense<0.000000e+00> : vector<8x16xf32>
    %113 = tpu.matmul %108, %84, %cst_36 {dimension_numbers = #tpu.dot_dimension_numbers<[1], [0], [0], [1], [0, 0, 1, 1], [], []>} : vector<8x8xf32>, vector<8x16xf32>, vector<8x16xf32> -> vector<8x16xf32>
    %cst_37 = arith.constant dense<0.000000e+00> : vector<8x16xf32>
    %114 = tpu.matmul %112, %74, %cst_37 {dimension_numbers = #tpu.dot_dimension_numbers<[1], [0], [0], [1], [0, 0, 1, 1], [], []>} : vector<8x8xf32>, vector<8x16xf32>, vector<8x16xf32> -> vector<8x16xf32>
    %115 = arith.addf %113, %114 : vector<8x16xf32>
    %116 = vector.broadcast %75 : vector<1x16xf32> to vector<8x16xf32>
    %117 = arith.mulf %115, %116 : vector<8x16xf32>
    %118 = vector.broadcast %76 : vector<1x16xf32> to vector<8x16xf32>
    %119 = arith.mulf %85, %118 : vector<8x16xf32>
    %120 = arith.addf %117, %119 : vector<8x16xf32>
    %cst_38 = arith.constant dense<0.000000e+00> : vector<8xf32>
    %121 = vector.multi_reduction <add>, %120, %cst_38 [1] : vector<8x16xf32> to vector<8xf32>
    %122 = vector.shape_cast %121 : vector<8xf32> to vector<8x1xf32>
    %123 = arith.negf %122 : vector<8x1xf32>
    %124 = math.exp %123 : vector<8x1xf32>
    %cst_39 = arith.constant 1.000000e+00 : f32
    %125 = vector.broadcast %cst_39 : f32 to vector<8x1xf32>
    %126 = arith.addf %125, %124 : vector<8x1xf32>
    %127 = arith.divf %125, %126 : vector<8x1xf32>
    %128 = vector.broadcast %127 : vector<8x1xf32> to vector<8x16xf32>
    %129 = arith.mulf %128, %85 : vector<8x16xf32>
    %cst_40 = arith.constant 1.000000e+00 : f32
    %130 = vector.broadcast %cst_40 : f32 to vector<8x1xf32>
    %131 = arith.subf %130, %127 : vector<8x1xf32>
    %132 = vector.broadcast %131 : vector<8x1xf32> to vector<8x16xf32>
    %133 = arith.mulf %132, %115 : vector<8x16xf32>
    %134 = arith.addf %129, %133 : vector<8x16xf32>
    %cst_41 = arith.constant 0.000000e+00 : f32
    %135 = vector.broadcast %cst_41 : f32 to vector<8x16xf32>
    %136 = arith.cmpf oge, %134, %135 : vector<8x16xf32>
    %cst_42 = arith.constant 0.00999999977 : f32
    %137 = vector.broadcast %cst_42 : f32 to vector<8x16xf32>
    %138 = arith.mulf %137, %134 : vector<8x16xf32>
    %139 = arith.select %136, %134, %138 : vector<8x16xi1>, vector<8x16xf32>
    %c0_43 = arith.constant 0 : index
    %c0_44 = arith.constant 0 : index
    %140 = vector.load %arg7[%c0_43, %c0_44] : memref<49x4xf32, #tpu.memory_space<vmem>>, vector<49x4xf32>
    %141 = vector.extract_strided_slice %140 {offsets = [0, 0], sizes = [32, 4], strides = [1, 1]} : vector<49x4xf32> to vector<32x4xf32>
    %142 = vector.extract_strided_slice %140 {offsets = [32, 0], sizes = [16, 4], strides = [1, 1]} : vector<49x4xf32> to vector<16x4xf32>
    %143 = vector.extract_strided_slice %140 {offsets = [48, 0], sizes = [1, 4], strides = [1, 1]} : vector<49x4xf32> to vector<1x4xf32>
    %cst_45 = arith.constant dense<0.000000e+00> : vector<8x4xf32>
    %144 = tpu.matmul %71, %141, %cst_45 {dimension_numbers = #tpu.dot_dimension_numbers<[1], [0], [0], [1], [0, 0, 1, 1], [], []>} : vector<8x32xf32>, vector<32x4xf32>, vector<8x4xf32> -> vector<8x4xf32>
    %cst_46 = arith.constant dense<0.000000e+00> : vector<8x4xf32>
    %145 = tpu.matmul %139, %142, %cst_46 {dimension_numbers = #tpu.dot_dimension_numbers<[1], [0], [0], [1], [0, 0, 1, 1], [], []>} : vector<8x16xf32>, vector<16x4xf32>, vector<8x4xf32> -> vector<8x4xf32>
    %146 = arith.addf %144, %145 : vector<8x4xf32>
    %147 = vector.broadcast %143 : vector<1x4xf32> to vector<8x4xf32>
    %148 = arith.addf %146, %147 : vector<8x4xf32>
    %c0_47 = arith.constant 0 : index
    %c0_48 = arith.constant 0 : index
    %149 = vector.load %arg8[%c0_47, %c0_48] : memref<8x4xf32, #tpu.memory_space<vmem>>, vector<8x4xf32>
    tpu.vector_store %arg8[%c0_47, %c0_48], %148 {strides = array<i32>} : memref<8x4xf32, #tpu.memory_space<vmem>>, vector<8x4xf32>,
    return
  }
}

</mosaic_0001>

<bundles_post_ra>
// kernel: ppn_forward.1
= control target key start
LH: loop header
LB: loop body
LE: loop exit
PB: predicated region body
PF: predicated region fallthrough
CT: control target
= control target key end

     0   :  { %v1721_v1 = vmov 0   ;;  %vm72_vm0 = vcmask 130048   ;;  %v1722_v5 = vmov 0.0   ;;  %v54_v6 = vlaneseq  ;;  %s1725_s13 = smov 96   ;;  %s1727_s24 = smov 32   ;;  %s2187_s3 = inlined_call_operand.vmem [shape: bf16[16,136], index: 3, kind: input, shape index: {}]   ;;  %s2188_s0 = inlined_call_operand.vmem [shape: f32[8,16], index: 0, kind: input, shape index: {}]   ;;  %s2189_s4 = inlined_call_operand.vmem [shape: f32[11,136], index: 4, kind: input, shape index: {}]   ;;  %s2190_s1 = inlined_call_operand.vmem [shape: bf16[8,8,8], index: 1, kind: input, shape index: {}]   ;;  %s2191_s2 = inlined_call_operand.vmem [shape: f32[8,8], index: 2, kind: input, shape index: {}]   ;;  %s2192_s5 = inlined_call_operand.vmem [shape: bf16[32,72], index: 5, kind: input, shape index: {}]   ;;  %s2193_s6 = inlined_call_operand.vmem [shape: f32[11,72], index: 6, kind: input, shape index: {}]   ;;  %s2194_s7 = inlined_call_operand.vmem [shape: f32[49,4], index: 7, kind: input, shape index: {}]   ;;  %s2195_s8 = inlined_call_operand.vmem [shape: f32[8,4], index: 8, kind: output, shape index: {}]  }
   0x1   :  { %v1700_v0 = vld [vmem:[%s2187_s3 + $0x4] ss:$8 sps:$4 sm:$0xff]   ;;  %108 = vmatprep.mubr.bf16.mxu0 %v1721_v1  ;;  %v1702_v2 = vld [vmem:[%s2187_s3] ss:$8 sps:$4 sm:$0xff]   ;;  %1620 = vmatprep.subr.mxu1 %v1722_v5  ;;  %vm1723_vm1 = vmmov 0   ;;  %v1595_v36 = vld [vmem:[%s2190_s1 + $0x10] sm:$0xff]  }
   0x2   :  { %v30_v3 = vld [vmem:[%s2188_s0] sm:$0xff]  ;;  %76 = vmatprep.subr.bf16.mxu0 %v1700_v0  ;;  %v1790_v7 = vshrl.u32 %v54_v6, 7  ;;  %1622 = vmatprep.mubr.msk.f32.mxu1 %vm1723_vm1, %v1722_v5  ;;  %v1724_v8 = vmov 1966171168   ;;  %v49_v12 = vld [vmem:[%s2189_s4 + $0x8] sm:$0xff]  ;;  %vm215_vm2 = vcmask 64512   ;;  %v1838_v40 = vunpack.c.l.bf16 %v1595_v36 }
   0x3   :  { %v51_v4 = vpack.c.bf16 %v30_v3, %v30_v3  ;;  %77 = vmatpush1.bf16.msra.mxu0 %v1702_v2  ;;  %v120_v9 = vunpack.c.l.s4 %v1724_v8  ;;  %v1802_v11 = vld [vmem:[%s2189_s4] sm:$0xff]  ;;  %v1594_v29 = vld [vmem:[%s2190_s1 + $0x8] sm:$0xff]   ;;  %v1849_v50 = vunpack.c.h.bf16 %v1595_v36  ;;  %v1596_v54 = vld [vmem:[%s2190_s1 + $0x18] sm:$0xff]   ;;  %vm300_vm3 = vcmask 261120   ;;  %s1728_s30 = smov 112   ;;  %s1730_s0 = smov 80  }
   0x4   :  { %1635 = vmatprep.subr.bf16.mxu0 %v1722_v5  ;;  %v1797_v10 = vsub.s32 0, %v1790_v7  ;;  %v1579_v28 = vld [vmem:[%s2190_s1] sm:$0xff]   ;;  %v1830_v34 = vunpack.c.l.bf16 %v1594_v29  ;;  %v1843_v45 = vunpack.c.h.bf16 %v1594_v29  ;;  %v1860_v58 = vunpack.c.l.bf16 %v1596_v54 }
   0x5   :  { %v121_v13 = vunpack.c.0.s8 %v120_v9  ;;  %v1826_v30 = vunpack.c.h.bf16 %v1579_v28  ;;  %v1857_v56 = vunpack.c.l.bf16 %v1579_v28  ;;  %v1868_v2 = vunpack.c.h.bf16 %v1596_v54 }
   0x6   :  { %1561 = vmatmul.mubr.msk.bf16.vlgmr.msra.gmra.mrb[0].mxu0 %vm72_vm0, %v51_v4  ;;  %v57_v14 = vrot.slane %v1802_v11, %v1797_v10  ;;  %v61_v15 = vrot.slane %v49_v12, %v1797_v10  ;;  %vm285_vm4 = vcmask 1041409   ;;  %vm287_vm5 = vcmask 1042434  }
   0x7   :  { %1639 = vmatprep.mubr.msk.bf16.mxu0 %vm1723_vm1, %v1722_v5  ;;  %v1811_v17 = vsub.s32 %v121_v13, %v1790_v7  ;;  %vm289_vm6 = vcmask 1043459   ;;  %vm291_vm7 = vcmask 1044484   ;;  %vm293_vm8 = vcmask 1045509  }
   0x8   :  { %vm295_vm9 = vcmask 1046534   ;;  %vm297_vm10 = vcmask 1047559   ;;  %vm526_vm11 = vcmask 1046528   ;;  %vm1553_vm14 = vcmask 31744  }
  0xd9   :  { %v110_v16 = vpop.f32.mrb[0].mxu0 }
  0xda   :  { %v1813_v18 = vadd.f32 %v110_v16, %v57_v14  ;;  %v112_v19 = vpop.f32.mrb[1].mxu0 }
  0xdb   :  { %v113_v20 = vadd.f32 %v112_v19, %v61_v15  ;;  %v114_v21 = vpop.f32.mrb[2].mxu0  ;;  %v252_v19 = vand.u32 127, %v54_v6 }
  0xdc   :  { %v115_v22 = vpop.f32.mrb[3].mxu0  ;;  %241 = vrot.lane.b32.xlu0 %v1813_v18, %s1725_s13 }
  0xdd   :  { %v118_v23 = vcombine.high %v113_v20, %v113_v20  ;;  %v125_v24 = vrot.slane %v113_v20, %v1811_v17  ;;  %v1883_v22 = vsub.s32 %v252_v19, %v1790_v7  ;;  %v440_v19 = vsub.s32 7, %v1790_v7 }
  0xdf   :  { %v132_v25 = vrot.slane %v118_v23, %v1811_v17  ;;  %v133_v26 = vcombine.high %v125_v24, %v125_v24  ;;  %v141_v27 = vrot.slane %v125_v24, %v1811_v17 }
  0xe1   :  { %v155_v31 = vrot.slane %v133_v26, %v1811_v17  ;;  %v163_v32 = vcombine.high %v141_v27, %v141_v27  ;;  %v148_v37 = vrot.slane %v132_v25, %v1811_v17  ;;  %v134_v39 = vcombine.high %v132_v25, %v132_v25 }
  0xe2   :  { %v170_v57 = vrot.slane %v141_v27, %v1797_v10 }
  0xe3   :  { %v174_v33 = vrot.slane %v155_v31, %v1797_v10  ;;  %v178_v35 = vrot.slane %v163_v32, %v1797_v10  ;;  %v186_v43 = vrot.slane %v148_v37, %v1797_v10  ;;  %v165_v44 = vcombine.high %v155_v31, %v155_v31 }
  0xe4   :  { %v162_v49 = vrot.slane %v134_v39, %v1811_v17  ;;  %v164_v55 = vcombine.high %v148_v37, %v148_v37  ;;  %v207_v63 = vmul.f32 %v1857_v56, %v170_v57 }
  0xe5   :  { %v208_v38 = vmul.f32 %v1826_v30, %v174_v33  ;;  %v209_v42 = vmul.f32 %v1830_v34, %v178_v35  ;;  %v211_v47 = vmul.f32 %v1838_v40, %v186_v43  ;;  %v182_v48 = vrot.slane %v165_v44, %v1797_v10 }
  0xe6   :  { %v190_v53 = vrot.slane %v162_v49, %v1797_v10  ;;  %v194_v61 = vrot.slane %v164_v55, %v1797_v10  ;;  %v166_v62 = vcombine.high %v162_v49, %v162_v49  ;;  %v216_v4 = vsel %vm215_vm2, %v207_v63, 0.0 }
  0xe7   :  { %v219_v41 = vsel %vm215_vm2, %v208_v38, 0.0  ;;  %v222_v46 = vsel %vm215_vm2, %v209_v42, 0.0  ;;  %v228_v51 = vsel %vm215_vm2, %v211_v47, 0.0  ;;  %v210_v52 = vmul.f32 %v1843_v45, %v182_v48 }
  0xe8   :  { %220 = vadd.xlane.f32.xlu1 %v219_v41  ;;  %v212_v60 = vmul.f32 %v1849_v50, %v190_v53  ;;  %v213_v1 = vmul.f32 %v1860_v58, %v194_v61  ;;  %v198_v3 = vrot.slane %v166_v62, %v1797_v10  ;;  %v1904_v53 = vld [vmem:[%s2191_s2] sm:$0xff]  ;;  %v1909_v61 = vsub.s32 1, %v1790_v7 }
  0xe9   :  { %v225_v59 = vsel %vm215_vm2, %v210_v52, 0.0 }
  0xea   :  { %v231_v0 = vsel %vm215_vm2, %v212_v60, 0.0  ;;  %v234_v8 = vsel %vm215_vm2, %v213_v1, 0.0  ;;  %v214_v9 = vmul.f32 %v1868_v2, %v198_v3  ;;  %v1918_v3 = vsub.s32 2, %v1790_v7 }
  0xec   :  { %223 = vadd.xlane.f32.xlu1 %v222_v46  ;;  %v237_v12 = vsel %vm215_vm2, %v214_v9, 0.0 }
  0xf0   :  { %229 = vadd.xlane.f32.xlu1 %v228_v51 }
  0xf4   :  { %226 = vadd.xlane.f32.xlu1 %v225_v59 }
  0xf8   :  { %232 = vadd.xlane.f32.xlu1 %v231_v0 }
  0xfb   :  { %217 = vadd.xlane.f32.xlu0 %v216_v4  ;;  %v412_v4 = vsub.s32 3, %v1790_v7 }
  0xfc   :  { %235 = vadd.xlane.f32.xlu1 %v234_v8 }
 0x100   :  { %238 = vadd.xlane.f32.xlu1 %v237_v12  ;;  %v419_v12 = vsub.s32 4, %v1790_v7 }
 0x14e   :  { %v242_v13 = vpop.permute.xlu0 %241 }
 0x14f   :  { %1621 = vmatpush3.xpose.msk.msra.mxu1 %vm300_vm3, %v242_v13  ;;  %v426_v13 = vsub.s32 5, %v1790_v7 }
 0x150   :  { %1625 = vmatprep.subr.mxu1 %v1722_v5 }
 0x152   :  { %1623 = vmatmul.mubr.msk.f32.vlgmr.msra.gmra.mrb[0].mxu1 %vm300_vm3, %v1813_v18 }
 0x153   :  { %1627 = vmatprep.mubr.msk.f32.mxu1 %vm1723_vm1, %v1722_v5 }
 0x175   :  { %v221_v14 = vpop.xlane.xlu1 %220 }
 0x176   :  { %v260_v24 = vrot.slane %v221_v14, %v1883_v22 }
 0x179   :  { %v224_v15 = vpop.xlane.xlu1 %223 }
 0x17a   :  { %v264_v27 = vrot.slane %v224_v15, %v1883_v22 }
 0x17d   :  { %v230_v16 = vpop.xlane.xlu1 %229 }
 0x17e   :  { %v272_v32 = vrot.slane %v230_v16, %v1883_v22  ;;  %v433_v16 = vsub.s32 6, %v1790_v7 }
 0x181   :  { %v227_v20 = vpop.xlane.xlu1 %226 }
 0x182   :  { %v268_v6 = vrot.slane %v227_v20, %v1883_v22  ;;  %v1939_v20 = vld [vmem:[%s2189_s4 + $0x10] sm:$0x7]  ;;  %s1726_s4 = smov 64  }
 0x185   :  { %v233_v25 = vpop.xlane.xlu1 %232 }
 0x186   :  { %v276_v35 = vrot.slane %v233_v25, %v1883_v22  ;;  %v687_v25 = vrot.slane %v1939_v20, %v1918_v3 }
 0x188   :  { %v218_v21 = vpop.xlane.xlu0 %217 }
 0x189   :  { %v256_v23 = vrot.slane %v218_v21, %v1883_v22  ;;  %v236_v29 = vpop.xlane.xlu1 %235  ;;  %v527_v21 = vrot.slane %v1802_v11, 1 }
 0x18a   :  { %v280_v38 = vrot.slane %v236_v29, %v1883_v22 }
 0x18b   :  { %v286_v26 = vsel %vm285_vm4, %v260_v24, %v256_v23 }
 0x18c   :  { %v288_v28 = vsel %vm287_vm5, %v264_v27, %v286_v26  ;;  %v528_v26 = vrot.slane %v1939_v20, 1 }
 0x18d   :  { %v290_v31 = vsel %vm289_vm6, %v268_v6, %v288_v28  ;;  %v239_v36 = vpop.xlane.xlu1 %238 }
 0x18e   :  { %v292_v33 = vsel %vm291_vm7, %v272_v32, %v290_v31  ;;  %v284_v39 = vrot.slane %v239_v36, %v1883_v22  ;;  %v529_v27 = vsel %vm526_vm11, %v527_v21, %v528_v26 }
 0x18f   :  { %v294_v37 = vsel %vm293_vm8, %v276_v35, %v292_v33  ;;  %1626 = vmatpush3.msra.mxu1 %v529_v27 }
 0x190   :  { %v296_v41 = vsel %vm295_vm9, %v280_v38, %v294_v37  ;;  %1630 = vmatprep.subr.mxu1 %v1722_v5 }
 0x191   :  { %v298_v42 = vsel %vm297_vm10, %v284_v39, %v296_v41 }
 0x225   :  { %v371_v43 = vpop.f32.mrb[0].mxu1 }
 0x226   :  { %v372_v44 = vadd.f32 %v371_v43, %v298_v42  ;;  %v1624_v46 = vpop.f32.mrb[1].mxu1 }
 0x228   :  { %v375_v47 = vmul.f32 0.17677669, %v372_v44 }
 0x22a   :  { %v376_v48 = vsel %vm215_vm2, %v375_v47, -inf }
 0x22b   :  { %377 = vmax.xlane.f32.xlu1 %v376_v48 }
 0x2b8   :  { %v378_v49 = vpop.xlane.xlu1 %377 }
 0x2b9   :  { %v379_v51 = vsub.f32 %v375_v47, %v378_v49 }
 0x2bb   :  { %v380_v52 = vmul.f32 1.442695, %v379_v51 }
 0x2bd   :  { %1705 = vpow2.f32 %v380_v52 }
 0x2c7   :  { %v1706_v54 = vpop.eup %1705 }
 0x2c8   :  { %v382_v55 = vmul.f32 %v1706_v54, %v1904_v53 }
 0x2ca   :  { %v383_v57 = vsel %vm215_vm2, %v382_v55, 0.0 }
 0x2cb   :  { %384 = vadd.xlane.f32.xlu1 %v383_v57 }
 0x358   :  { %v385_v59 = vpop.xlane.xlu1 %384 }
 0x359   :  { %v386_v60 = vmax.f32 %v385_v59, 1e-20 }
 0x35b   :  { %1707 = vrcp.f32 %v386_v60 }
 0x365   :  { %v1708_v62 = vpop.eup %1707 }
 0x366   :  { %v1911_v63 = vmul.f32 %v1708_v62, %v382_v55 }
 0x368   :  { %v399_v0 = vrot.slane %v1911_v63, %v1909_v61  ;;  %v392_v1 = vrot.slane %v1911_v63, %v1797_v10  ;;  %v406_v8 = vrot.slane %v1911_v63, %v1918_v3  ;;  %v413_v9 = vrot.slane %v1911_v63, %v412_v4 }
 0x369   :  { %v420_v14 = vrot.slane %v1911_v63, %v419_v12  ;;  %v427_v15 = vrot.slane %v1911_v63, %v426_v13  ;;  %v434_v23 = vrot.slane %v1911_v63, %v433_v16  ;;  %v441_v24 = vrot.slane %v1911_v63, %v440_v19 }
 0x36a   :  { %401 = vbcast.lane.b32.xlu1 %v399_v0, 256  ;;  %394 = vbcast.lane.b32.xlu0 %v392_v1, 256 }
 0x36e   :  { %408 = vbcast.lane.b32.xlu1 %v406_v8, 256  ;;  %415 = vbcast.lane.b32.xlu0 %v413_v9, 256 }
 0x372   :  { %422 = vbcast.lane.b32.xlu1 %v420_v14, 256  ;;  %429 = vbcast.lane.b32.xlu0 %v427_v15, 256 }
 0x376   :  { %436 = vbcast.lane.b32.xlu1 %v434_v23, 256  ;;  %443 = vbcast.lane.b32.xlu0 %v441_v24, 256 }
 0x37a   :  { %603 = vrot.lane.b32.xlu1 %v1813_v18, %s1726_s4  ;;  %689 = vrot.lane.b32.xlu0 %v687_v25, %s1725_s13 }
 0x3dc   :  { %v402_v11 = vpop.permute.xlu1 %401  ;;  %v395_v28 = vpop.permute.xlu0 %394 }
 0x3dd   :  { %v446_v6 = vmul.f32 %v1826_v30, %v402_v11  ;;  %v445_v29 = vmul.f32 %v1857_v56, %v395_v28 }
 0x3df   :  { %v460_v31 = vsel %vm215_vm2, %v446_v6, 0.0  ;;  %v453_v32 = vsel %vm215_vm2, %v445_v29, 0.0 }
 0x3e0   :  { %v461_v33 = vrot.slane %v460_v31, 4  ;;  %v454_v35 = vrot.slane %v453_v32, 4  ;;  %v409_v36 = vpop.permute.xlu1 %408  ;;  %v416_v37 = vpop.permute.xlu0 %415 }
 0x3e1   :  { %v447_v38 = vmul.f32 %v1830_v34, %v409_v36  ;;  %v448_v39 = vmul.f32 %v1843_v45, %v416_v37 }
 0x3e2   :  { %v462_v41 = vadd.f32 %v461_v33, %v460_v31  ;;  %v455_v42 = vadd.f32 %v454_v35, %v453_v32 }
 0x3e3   :  { %v467_v43 = vsel %vm215_vm2, %v447_v38, 0.0  ;;  %v474_v44 = vsel %vm215_vm2, %v448_v39, 0.0 }
 0x3e4   :  { %v463_v46 = vrot.slane %v462_v41, 2  ;;  %v456_v47 = vrot.slane %v455_v42, 2  ;;  %v468_v48 = vrot.slane %v467_v43, 4  ;;  %v475_v49 = vrot.slane %v474_v44, 4  ;;  %v423_v51 = vpop.permute.xlu1 %422  ;;  %v430_v52 = vpop.permute.xlu0 %429 }
 0x3e5   :  { %v449_v54 = vmul.f32 %v1838_v40, %v423_v51  ;;  %v450_v55 = vmul.f32 %v1849_v50, %v430_v52 }
 0x3e6   :  { %v464_v57 = vadd.f32 %v463_v46, %v462_v41  ;;  %v457_v59 = vadd.f32 %v456_v47, %v455_v42  ;;  %v469_v60 = vadd.f32 %v468_v48, %v467_v43  ;;  %v476_v62 = vadd.f32 %v475_v49, %v474_v44 }
 0x3e7   :  { %v481_v0 = vsel %vm215_vm2, %v449_v54, 0.0  ;;  %v488_v1 = vsel %vm215_vm2, %v450_v55, 0.0 }
 0x3e8   :  { %v465_v8 = vrot.slane %v464_v57, 1  ;;  %v458_v9 = vrot.slane %v457_v59, 1  ;;  %v470_v14 = vrot.slane %v469_v60, 2  ;;  %v477_v15 = vrot.slane %v476_v62, 2  ;;  %v437_v21 = vpop.permute.xlu1 %436  ;;  %v444_v23 = vpop.permute.xlu0 %443 }
 0x3e9   :  { %v482_v24 = vrot.slane %v481_v0, 4  ;;  %v489_v25 = vrot.slane %v488_v1, 4  ;;  %v451_v26 = vmul.f32 %v1860_v58, %v437_v21  ;;  %v452_v27 = vmul.f32 %v1868_v2, %v444_v23 }
 0x3ea   :  { %v466_v11 = vadd.f32 %v465_v8, %v464_v57  ;;  %v471_v28 = vadd.f32 %v470_v14, %v469_v60  ;;  %v478_v6 = vadd.f32 %v477_v15, %v476_v62  ;;  %v459_v35 = vadd.f32 %v458_v9, %v457_v59 }
 0x3eb   :  { %v483_v29 = vadd.f32 %v482_v24, %v481_v0  ;;  %v490_v31 = vadd.f32 %v489_v25, %v488_v1  ;;  %v495_v32 = vsel %vm215_vm2, %v451_v26, 0.0  ;;  %v502_v33 = vsel %vm215_vm2, %v452_v27, 0.0 }
 0x3ec   :  { %v472_v36 = vrot.slane %v471_v28, 1  ;;  %v479_v37 = vrot.slane %v478_v6, 1  ;;  %v496_v38 = vrot.slane %v495_v32, 4  ;;  %v690_v39 = vpop.permute.xlu0 %689  ;;  %v503_v43 = vrot.slane %v502_v33, 4 }
 0x3ed   :  { %v484_v41 = vrot.slane %v483_v29, 2  ;;  %v491_v42 = vrot.slane %v490_v31, 2  ;;  %v692_v44 = vmul.f32 %v690_v39, %v1813_v18  ;;  %v517_v52 = vsel %vm285_vm4, %v466_v11, %v459_v35 }
 0x3ee   :  { %v473_v46 = vadd.f32 %v472_v36, %v471_v28  ;;  %v497_v47 = vadd.f32 %v496_v38, %v495_v32  ;;  %v504_v51 = vadd.f32 %v503_v43, %v502_v33  ;;  %v480_v54 = vadd.f32 %v479_v37, %v478_v6  ;;  %v604_v28 = vpop.permute.xlu1 %603  ;;  %v1704_v43 = vld [vmem:[%s2192_s5 + $0x8] sm:$0xff]  }
 0x3ef   :  { %v485_v48 = vadd.f32 %v484_v41, %v483_v29  ;;  %v492_v49 = vadd.f32 %v491_v42, %v490_v31  ;;  %694 = vrot.lane.b32.xlu1 %v692_v44, %s1727_s24  ;;  %v682_v6 = vrot.slane %v1939_v20, %v1909_v61  ;;  %v1703_v42 = vld [vmem:[%s2192_s5] sm:$0xff]  }
 0x3f0   :  { %v498_v55 = vrot.slane %v497_v47, 2  ;;  %v518_v57 = vsel %vm287_vm5, %v473_v46, %v517_v52  ;;  %v505_v62 = vrot.slane %v504_v51, 2  ;;  %1636 = vmatpush3.bf16.msra.mxu0 %v1703_v42 }
 0x3f1   :  { %v486_v59 = vrot.slane %v485_v48, 1  ;;  %v493_v60 = vrot.slane %v492_v49, 1  ;;  %v519_v14 = vsel %vm289_vm6, %v480_v54, %v518_v57  ;;  %1637 = vmatprep.subr.bf16.mxu0 %v1722_v5 }
 0x3f2   :  { %v499_v0 = vadd.f32 %v498_v55, %v497_v47  ;;  %v506_v9 = vadd.f32 %v505_v62, %v504_v51 }
 0x3f3   :  { %v487_v1 = vadd.f32 %v486_v59, %v485_v48  ;;  %v494_v8 = vadd.f32 %v493_v60, %v492_v49 }
 0x3f4   :  { %v500_v15 = vrot.slane %v499_v0, 1  ;;  %v507_v23 = vrot.slane %v506_v9, 1  ;;  %1638 = vmatpush3.bf16.msra.mxu0 %v1704_v43 }
 0x3f5   :  { %v520_v21 = vsel %vm291_vm7, %v487_v1, %v519_v14  ;;  %1648 = vmatprep.subr.mxu0 %v1722_v5 }
 0x3f6   :  { %v501_v24 = vadd.f32 %v500_v15, %v499_v0  ;;  %v508_v25 = vadd.f32 %v507_v23, %v506_v9  ;;  %v521_v26 = vsel %vm293_vm8, %v494_v8, %v520_v21 }
 0x3f8   :  { %v522_v27 = vsel %vm295_vm9, %v501_v24, %v521_v26 }
 0x3f9   :  { %v523_v11 = vsel %vm297_vm10, %v508_v25, %v522_v27 }
 0x3fa   :  { %1628 = vmatmul.mubr.msk.f32.vlgmr.msra.gmra.mrb[2].mxu1 %vm215_vm2, %v523_v11 }
 0x3fb   :  { %1631 = vmatpush3.msra.mxu1 %v604_v28  ;;  %1632 = vmatprep.mubr.msk.f32.mxu1 %vm1723_vm1, %v1722_v5 }
 0x3fc   :  { %1643 = vmatprep.subr.mxu1 %v1722_v5 }
 0x402   :  { %1633 = vmatmul.mubr.msk.f32.vlgmr.msra.gmra.mrb[2].mxu1 %vm215_vm2, %v1911_v63 }
 0x403   :  { %1645 = vmatprep.mubr.msk.f32.mxu1 %vm1723_vm1, %v1722_v5 }
 0x461   :  { %v695_v33 = vpop.permute.xlu1 %694 }
 0x4d5   :  { %v675_v29 = vpop.f32.mrb[2].mxu1 }
 0x4d6   :  { %v683_v31 = vmul.f32 %v682_v6, %v675_v29  ;;  %v1634_v32 = vpop.f32.mrb[3].mxu1 }
 0x4d8   :  { %v697_v35 = vadd.f32 %v695_v33, %v683_v31 }
 0x4da   :  { %v698_v36 = vsel %vm300_vm3, %v697_v35, 0.0 }
 0x4db   :  { %699 = vadd.xlane.f32.xlu0 %v698_v36 }
 0x568   :  { %v700_v37 = vpop.xlane.xlu0 %699 }
 0x569   :  { %v1566_v38 = vmul.f32 -1.442695, %v700_v37 }
 0x56b   :  { %1709 = vpow2.f32 %v1566_v38 }
 0x575   :  { %v1710_v39 = vpop.eup %1709 }
 0x576   :  { %v704_v41 = vadd.f32 1.0, %v1710_v39 }
 0x578   :  { %1711 = vrcp.f32 %v704_v41 }
 0x582   :  { %v1712_v63 = vpop.eup %1711 }
 0x583   :  { %v708_v20 = vsub.f32 1.0, %v1712_v63  ;;  %v707_v46 = vmul.f32 %v1712_v63, %v1813_v18  ;;  %v2013_v18 = vld [vmem:[%s2193_s6] sm:$0xff] }
 0x584   :  { %v728_v55 = vrot.slane %v2013_v18, %v1797_v10 }
 0x585   :  { %v709_v44 = vmul.f32 %v708_v20, %v675_v29 }
 0x587   :  { %711 = vrot.lane.b32.xlu1 %v709_v44, %s1725_s13 }
 0x5f9   :  { %v712_v47 = vpop.permute.xlu1 %711 }
 0x5fa   :  { %v714_v48 = vadd.f32 %v712_v47, %v707_v46 }
 0x5fc   :  { %vm715_vm12 = vcmp.ge.f32.partialorder %v714_v48, 0.0  ;;  %v716_v49 = vmul.f32 0.01, %v714_v48 }
 0x5fe   :  { %v2002_v51 = vsel %vm715_vm12, %v714_v48, %v716_v49 }
 0x5ff   :  { %v720_v52 = vpack.c.bf16 %v2002_v51, %v2002_v51 }
 0x601   :  { %730 = vrot.lane.b32.xlu1 %v720_v52, %s1727_s24 }
 0x673   :  { %v731_v54 = vpop.permute.xlu1 %730 }
 0x674   :  { %1640 = vmatmul.mubr.msk.bf16.vlgmr.msra.gmra.mrb[4].mxu0 %vm300_vm3, %v731_v54 }
 0x675   :  { %1650 = vmatprep.mubr.msk.f32.mxu0 %vm1723_vm1, %v1722_v5 }
 0x747   :  { %v781_v57 = vpop.f32.mrb[4].mxu0 }
 0x748   :  { %v2017_v59 = vadd.f32 %v781_v57, %v728_v55  ;;  %v1641_v60 = vpop.f32.mrb[5].mxu0 }
 0x749   :  { %v784_v62 = vpop.f32.mrb[6].mxu0 }
 0x74a   :  { %925 = vrot.lane.b32.xlu1 %v2017_v59, %s1728_s30  ;;  %v1642_v0 = vpop.f32.mrb[7].mxu0  ;;  %v795_v1 = vrot.slane %v2017_v59, %v1811_v17  ;;  %v788_v8 = vcombine.high %v2017_v59, %v2017_v59 }
 0x74c   :  { %v811_v9 = vrot.slane %v795_v1, %v1811_v17  ;;  %v803_v14 = vcombine.high %v795_v1, %v795_v1  ;;  %v802_v15 = vrot.slane %v788_v8, %v1811_v17 }
 0x74e   :  { %v840_v21 = vrot.slane %v811_v9, %v1797_v10  ;;  %v825_v23 = vrot.slane %v803_v14, %v1811_v17  ;;  %v804_v24 = vcombine.high %v802_v15, %v802_v15  ;;  %v833_v11 = vcombine.high %v811_v9, %v811_v9 }
 0x74f   :  { %v818_v6 = vrot.slane %v802_v15, %v1811_v17 }
 0x750   :  { %869 = vrot.lane.b32.xlu1 %v840_v21, %s1726_s4  ;;  %v832_v25 = vrot.slane %v804_v24, %v1811_v17  ;;  %v844_v26 = vrot.slane %v825_v23, %v1797_v10  ;;  %v848_v28 = vrot.slane %v833_v11, %v1797_v10  ;;  %v835_v31 = vcombine.high %v825_v23, %v825_v23 }
 0x751   :  { %v856_v29 = vrot.slane %v818_v6, %v1797_v10  ;;  %v834_v33 = vcombine.high %v818_v6, %v818_v6 }
 0x752   :  { %v860_v27 = vrot.slane %v832_v25, %v1797_v10  ;;  %v852_v32 = vrot.slane %v835_v31, %v1797_v10  ;;  %v836_v36 = vcombine.high %v832_v25, %v832_v25 }
 0x753   :  { %v864_v35 = vrot.slane %v834_v33, %v1797_v10 }
 0x754   :  { %871 = vrot.lane.b32.xlu1 %v844_v26, %s1726_s4  ;;  %879 = vrot.lane.b32.xlu0 %v860_v27, %s1726_s4  ;;  %v868_v37 = vrot.slane %v836_v36, %v1797_v10 }
 0x758   :  { %873 = vrot.lane.b32.xlu1 %v848_v28, %s1726_s4 }
 0x75c   :  { %877 = vrot.lane.b32.xlu1 %v856_v29, %s1726_s4 }
 0x760   :  { %875 = vrot.lane.b32.xlu1 %v852_v32, %s1726_s4 }
 0x764   :  { %881 = vrot.lane.b32.xlu1 %v864_v35, %s1726_s4 }
 0x768   :  { %883 = vrot.lane.b32.xlu1 %v868_v37, %s1726_s4 }
 0x7bc   :  { %v926_v17 = vpop.permute.xlu1 %925 }
 0x7bd   :  { %1644 = vmatpush3.xpose.msk.msra.mxu1 %vm72_vm0, %v926_v17 }
 0x7c0   :  { %1646 = vmatmul.mubr.msk.f32.vlgmr.msra.gmra.mrb[4].mxu1 %vm72_vm0, %v2017_v59 }
 0x7c1   :  { %1662 = vmatprep.mubr.msk.f32.mxu1 %vm1723_vm1, %v1722_v5 }
 0x7c2   :  { %v870_v38 = vpop.permute.xlu1 %869 }
 0x7c3   :  { %v893_v39 = vmul.f32 %v1857_v56, %v870_v38 }
 0x7c5   :  { %v901_v41 = vsel %vm215_vm2, %v893_v39, 0.0 }
 0x7c6   :  { %v872_v63 = vpop.permute.xlu1 %871  ;;  %902 = vadd.xlane.f32.xlu1 %v901_v41  ;;  %v880_v52 = vpop.permute.xlu0 %879 }
 0x7c7   :  { %v894_v42 = vmul.f32 %v1826_v30, %v872_v63  ;;  %v898_v57 = vmul.f32 %v1849_v50, %v880_v52 }
 0x7c9   :  { %v904_v20 = vsel %vm215_vm2, %v894_v42, 0.0  ;;  %v916_v8 = vsel %vm215_vm2, %v898_v57, 0.0 }
 0x7ca   :  { %v874_v43 = vpop.permute.xlu1 %873  ;;  %905 = vadd.xlane.f32.xlu0 %v904_v20 }
 0x7cb   :  { %v895_v44 = vmul.f32 %v1830_v34, %v874_v43 }
 0x7cd   :  { %v907_v46 = vsel %vm215_vm2, %v895_v44, 0.0 }
 0x7ce   :  { %v878_v47 = vpop.permute.xlu1 %877  ;;  %908 = vadd.xlane.f32.xlu1 %v907_v46 }
 0x7cf   :  { %v897_v48 = vmul.f32 %v1838_v40, %v878_v47 }
 0x7d1   :  { %v913_v49 = vsel %vm215_vm2, %v897_v48, 0.0 }
 0x7d2   :  { %v876_v54 = vpop.permute.xlu1 %875  ;;  %914 = vadd.xlane.f32.xlu0 %v913_v49 }
 0x7d3   :  { %v896_v55 = vmul.f32 %v1843_v45, %v876_v54 }
 0x7d5   :  { %v910_v60 = vsel %vm215_vm2, %v896_v55, 0.0 }
 0x7d6   :  { %v882_v62 = vpop.permute.xlu1 %881  ;;  %911 = vadd.xlane.f32.xlu1 %v910_v60 }
 0x7d7   :  { %v899_v0 = vmul.f32 %v1860_v58, %v882_v62 }
 0x7d9   :  { %v919_v1 = vsel %vm215_vm2, %v899_v0, 0.0 }
 0x7da   :  { %920 = vadd.xlane.f32.xlu0 %v919_v1  ;;  %917 = vadd.xlane.f32.xlu1 %v916_v8  ;;  %v884_v9 = vpop.permute.xlu1 %883 }
 0x7db   :  { %v900_v14 = vmul.f32 %v1868_v2, %v884_v9 }
 0x7dd   :  { %v922_v15 = vsel %vm215_vm2, %v900_v14, 0.0 }
 0x7de   :  { %923 = vadd.xlane.f32.xlu1 %v922_v15 }
 0x853   :  { %v903_v21 = vpop.xlane.xlu1 %902 }
 0x854   :  { %v938_v28 = vrot.slane %v903_v21, %v1883_v22 }
 0x857   :  { %v906_v25 = vpop.xlane.xlu0 %905 }
 0x858   :  { %v942_v26 = vrot.slane %v906_v25, %v1883_v22 }
 0x85a   :  { %v967_v31 = vsel %vm285_vm4, %v942_v26, %v938_v28 }
 0x85b   :  { %v909_v23 = vpop.xlane.xlu1 %908 }
 0x85c   :  { %v946_v27 = vrot.slane %v909_v23, %v1883_v22  ;;  %v1200_v23 = vrot.slane %v2013_v18, 1 }
 0x85e   :  { %v968_v32 = vsel %vm287_vm5, %v946_v27, %v967_v31 }
 0x85f   :  { %v915_v6 = vpop.xlane.xlu0 %914 }
 0x860   :  { %v954_v37 = vrot.slane %v915_v6, %v1883_v22 }
 0x863   :  { %v912_v24 = vpop.xlane.xlu1 %911 }
 0x864   :  { %v950_v29 = vrot.slane %v912_v24, %v1883_v22 }
 0x866   :  { %v969_v33 = vsel %vm289_vm6, %v950_v29, %v968_v32 }
 0x867   :  { %v918_v11 = vpop.xlane.xlu1 %917  ;;  %v921_v35 = vpop.xlane.xlu0 %920  ;;  %v970_v39 = vsel %vm291_vm7, %v954_v37, %v969_v33 }
 0x868   :  { %v958_v36 = vrot.slane %v918_v11, %v1883_v22  ;;  %v962_v38 = vrot.slane %v921_v35, %v1883_v22 }
 0x86a   :  { %v971_v41 = vsel %vm293_vm8, %v958_v36, %v970_v39 }
 0x86b   :  { %v924_v17 = vpop.xlane.xlu1 %923  ;;  %v972_v42 = vsel %vm295_vm9, %v962_v38, %v971_v41 }
 0x86c   :  { %v966_v63 = vrot.slane %v924_v17, %v1883_v22 }
 0x86e   :  { %v973_v20 = vsel %vm297_vm10, %v966_v63, %v972_v42 }
 0x893   :  { %v1045_v43 = vpop.f32.mrb[4].mxu1 }
 0x894   :  { %v1046_v44 = vadd.f32 %v1045_v43, %v973_v20  ;;  %v1647_v46 = vpop.f32.mrb[5].mxu1 }
 0x896   :  { %v1049_v47 = vmul.f32 0.25, %v1046_v44 }
 0x898   :  { %v1050_v48 = vsel %vm215_vm2, %v1049_v47, -inf }
 0x899   :  { %1051 = vmax.xlane.f32.xlu0 %v1050_v48 }
 0x926   :  { %v1052_v49 = vpop.xlane.xlu0 %1051 }
 0x927   :  { %v1053_v52 = vsub.f32 %v1049_v47, %v1052_v49 }
 0x929   :  { %v1054_v54 = vmul.f32 1.442695, %v1053_v52 }
 0x92b   :  { %1713 = vpow2.f32 %v1054_v54 }
 0x935   :  { %v1714_v55 = vpop.eup %1713 }
 0x936   :  { %v1056_v57 = vmul.f32 %v1714_v55, %v1904_v53 }
 0x938   :  { %v1057_v22 = vsel %vm215_vm2, %v1056_v57, 0.0 }
 0x939   :  { %1058 = vadd.xlane.f32.xlu1 %v1057_v22 }
 0x9c6   :  { %v1059_v60 = vpop.xlane.xlu1 %1058 }
 0x9c7   :  { %v1060_v62 = vmax.f32 %v1059_v60, 1e-20 }
 0x9c9   :  { %1715 = vrcp.f32 %v1060_v62 }
 0x9d3   :  { %v1716_v0 = vpop.eup %1715 }
 0x9d4   :  { %v2084_v1 = vmul.f32 %v1716_v0, %v1056_v57 }
 0x9d6   :  { %v1073_v8 = vrot.slane %v2084_v1, %v1909_v61  ;;  %v1066_v9 = vrot.slane %v2084_v1, %v1797_v10  ;;  %v1080_v53 = vrot.slane %v2084_v1, %v1918_v3  ;;  %v1094_v14 = vrot.slane %v2084_v1, %v419_v12  ;;  %v2107_v12 = vld [vmem:[%s2193_s6 + $0x8] sm:$0x7]  ;;  %s1729_s6 = smov 48  }
 0x9d7   :  { %v1087_v15 = vrot.slane %v2084_v1, %v412_v4  ;;  %v1108_v21 = vrot.slane %v2084_v1, %v433_v16  ;;  %v1101_v10 = vrot.slane %v2084_v1, %v426_v13  ;;  %v1201_v24 = vrot.slane %v2107_v12, 1 }
 0x9d8   :  { %1075 = vbcast.lane.b32.xlu1 %v1073_v8, 256  ;;  %1068 = vbcast.lane.b32.xlu0 %v1066_v9, 256  ;;  %v1115_v4 = vrot.slane %v2084_v1, %v440_v19  ;;  %v1360_v13 = vrot.slane %v2107_v12, %v1918_v3 }
 0x9d9   :  { %v1202_v16 = vsel %vm526_vm11, %v1200_v23, %v1201_v24 }
 0x9da   :  { %1649 = vmatpush3.msra.mxu0 %v1202_v16 }
 0x9db   :  { %1653 = vmatprep.subr.mxu0 %v1722_v5 }
 0x9dc   :  { %1082 = vbcast.lane.b32.xlu1 %v1080_v53, 256  ;;  %1096 = vbcast.lane.b32.xlu0 %v1094_v14, 256 }
 0x9e0   :  { %1089 = vbcast.lane.b32.xlu1 %v1087_v15, 256  ;;  %1110 = vbcast.lane.b32.xlu0 %v1108_v21, 256 }
 0x9e4   :  { %1103 = vbcast.lane.b32.xlu1 %v1101_v10, 256  ;;  %1276 = vrot.lane.b32.xlu0 %v2017_v59, %s1725_s13 }
 0x9e8   :  { %1117 = vbcast.lane.b32.xlu1 %v1115_v4, 256 }
 0x9ec   :  { %1362 = vrot.lane.b32.xlu1 %v1360_v13, %s1729_s6 }
 0xa4a   :  { %v1076_v18 = vpop.permute.xlu1 %1075  ;;  %v1069_v25 = vpop.permute.xlu0 %1068 }
 0xa4b   :  { %v1120_v26 = vmul.f32 %v1826_v30, %v1076_v18  ;;  %v1119_v7 = vmul.f32 %v1857_v56, %v1069_v25 }
 0xa4d   :  { %v1134_v19 = vsel %vm215_vm2, %v1120_v26, 0.0  ;;  %v1127_v27 = vsel %vm215_vm2, %v1119_v7, 0.0 }
 0xa4e   :  { %v1135_v11 = vrot.slane %v1134_v19, 4  ;;  %v1128_v3 = vrot.slane %v1127_v27, 4  ;;  %v1083_v28 = vpop.permute.xlu1 %1082  ;;  %v1097_v6 = vpop.permute.xlu0 %1096 }
 0xa4f   :  { %v1121_v29 = vmul.f32 %v1830_v34, %v1083_v28  ;;  %v1123_v31 = vmul.f32 %v1838_v40, %v1097_v6 }
 0xa50   :  { %v1136_v32 = vadd.f32 %v1135_v11, %v1134_v19  ;;  %v1129_v33 = vadd.f32 %v1128_v3, %v1127_v27 }
 0xa51   :  { %v1141_v35 = vsel %vm215_vm2, %v1121_v29, 0.0  ;;  %v1155_v30 = vsel %vm215_vm2, %v1123_v31, 0.0 }
 0xa52   :  { %v1137_v36 = vrot.slane %v1136_v32, 2  ;;  %v1130_v56 = vrot.slane %v1129_v33, 2  ;;  %v1142_v37 = vrot.slane %v1141_v35, 4  ;;  %v1156_v17 = vrot.slane %v1155_v30, 4  ;;  %v1090_v38 = vpop.permute.xlu1 %1089  ;;  %v1111_v39 = vpop.permute.xlu0 %1110 }
 0xa53   :  { %v1122_v41 = vmul.f32 %v1843_v45, %v1090_v38  ;;  %v1125_v63 = vmul.f32 %v1860_v58, %v1111_v39 }
 0xa54   :  { %v1138_v42 = vadd.f32 %v1137_v36, %v1136_v32  ;;  %v1143_v34 = vadd.f32 %v1142_v37, %v1141_v35  ;;  %v1157_v20 = vadd.f32 %v1156_v17, %v1155_v30  ;;  %v1131_v40 = vadd.f32 %v1130_v56, %v1129_v33 }
 0xa55   :  { %v1148_v43 = vsel %vm215_vm2, %v1122_v41, 0.0  ;;  %v1169_v44 = vsel %vm215_vm2, %v1125_v63, 0.0 }
 0xa56   :  { %v1144_v46 = vrot.slane %v1143_v34, 2  ;;  %v1104_v47 = vpop.permute.xlu1 %1103  ;;  %v1158_v48 = vrot.slane %v1157_v20, 2  ;;  %v1149_v49 = vrot.slane %v1148_v43, 4  ;;  %v1170_v52 = vrot.slane %v1169_v44, 4  ;;  %v1277_v63 = vpop.permute.xlu0 %1276 }
 0xa57   :  { %v1124_v54 = vmul.f32 %v1849_v50, %v1104_v47  ;;  %v1139_v55 = vrot.slane %v1138_v42, 1  ;;  %v1132_v45 = vrot.slane %v1131_v40, 1 }
 0xa58   :  { %v1145_v57 = vadd.f32 %v1144_v46, %v1143_v34  ;;  %v1150_v22 = vadd.f32 %v1149_v49, %v1148_v43  ;;  %v1171_v58 = vadd.f32 %v1170_v52, %v1169_v44  ;;  %v1159_v9 = vadd.f32 %v1158_v48, %v1157_v20 }
 0xa59   :  { %v1162_v60 = vsel %vm215_vm2, %v1124_v54, 0.0  ;;  %v1140_v10 = vadd.f32 %v1139_v55, %v1138_v42  ;;  %v1133_v23 = vadd.f32 %v1132_v45, %v1131_v40  ;;  %v1355_v42 = vrot.slane %v2107_v12, %v1909_v61  ;;  %v1395_v61 = vld [vmem:[%s2194_s7 + $0x20] sm:$0xff]  ;;  %v1396_v12 = vld [vmem:[%s2194_s7 + $0x28] sm:$0xff] }
 0xa5a   :  { %v1146_v62 = vrot.slane %v1145_v57, 1  ;;  %v1163_v0 = vrot.slane %v1162_v60, 4  ;;  %v1118_v8 = vpop.permute.xlu1 %1117  ;;  %v1151_v53 = vrot.slane %v1150_v22, 2  ;;  %v1172_v14 = vrot.slane %v1171_v58, 2 }
 0xa5b   :  { %v1126_v15 = vmul.f32 %v1868_v2, %v1118_v8  ;;  %v1160_v25 = vrot.slane %v1159_v9, 1  ;;  %v1191_v3 = vsel %vm285_vm4, %v1140_v10, %v1133_v23  ;;  %v1677_v45 = vpack.c.bf16 %v1396_v12, %v1395_v61  ;;  %v1391_v8 = vld [vmem:[%s2194_s7] sm:$0xff] }
 0xa5c   :  { %v1164_v21 = vadd.f32 %v1163_v0, %v1162_v60  ;;  %v1152_v24 = vadd.f32 %v1151_v53, %v1150_v22  ;;  %v1147_v4 = vadd.f32 %v1146_v62, %v1145_v57  ;;  %v1173_v7 = vadd.f32 %v1172_v14, %v1171_v58  ;;  %v1394_v14 = vld [vmem:[%s2194_s7 + $0x18] sm:$0xff] }
 0xa5d   :  { %v1176_v50 = vsel %vm215_vm2, %v1126_v15, 0.0  ;;  %v1161_v31 = vadd.f32 %v1160_v25, %v1159_v9  ;;  %v1392_v9 = vld [vmem:[%s2194_s7 + $0x8] sm:$0xff] }
 0xa5e   :  { %v1165_v13 = vrot.slane %v1164_v21, 2  ;;  %v1177_v16 = vrot.slane %v1176_v50, 4  ;;  %v1363_v18 = vpop.permute.xlu1 %1362  ;;  %v1153_v26 = vrot.slane %v1152_v24, 1  ;;  %v1192_v28 = vsel %vm287_vm5, %v1147_v4, %v1191_v3 }
 0xa5f   :  { %v1365_v19 = vmul.f32 %v1363_v18, %v2017_v59  ;;  %v1174_v33 = vrot.slane %v1173_v7, 1  ;;  %v1680_v53 = vpack.c.bf16 %v1392_v9, %v1391_v8 }
 0xa60   :  { %v1166_v27 = vadd.f32 %v1165_v13, %v1164_v21  ;;  %v1178_v11 = vadd.f32 %v1177_v16, %v1176_v50  ;;  %v1154_v2 = vadd.f32 %v1153_v26, %v1152_v24  ;;  %v1577_v24 = vld [vmem:[%s2194_s7 + $0x30] ss:$0 sm:$0xff] }
 0xa61   :  { %1367 = vrot.lane.b32.xlu0 %v1365_v19, %s1730_s0  ;;  %v1175_v17 = vadd.f32 %v1174_v33, %v1173_v7 }
 0xa62   :  { %v1167_v6 = vrot.slane %v1166_v27, 1  ;;  %v1179_v29 = vrot.slane %v1178_v11, 2  ;;  %v1193_v32 = vsel %vm289_vm6, %v1154_v2, %v1192_v28 }
 0xa63   :  { %v1194_v36 = vsel %vm291_vm7, %v1161_v31, %v1193_v32 }
 0xa64   :  { %v1168_v35 = vadd.f32 %v1167_v6, %v1166_v27  ;;  %v1180_v30 = vadd.f32 %v1179_v29, %v1178_v11 }
 0xa66   :  { %v1181_v56 = vrot.slane %v1180_v30, 1  ;;  %v1195_v37 = vsel %vm293_vm8, %v1168_v35, %v1194_v36 }
 0xa67   :  { %v1196_v39 = vsel %vm295_vm9, %v1175_v17, %v1195_v37 }
 0xa68   :  { %v1182_v38 = vadd.f32 %v1181_v56, %v1180_v30 }
 0xa6a   :  { %v1197_v41 = vsel %vm297_vm10, %v1182_v38, %v1196_v39 }
 0xa6b   :  { %1651 = vmatmul.mubr.msk.f32.vlgmr.msra.gmra.mrb[8].mxu0 %vm215_vm2, %v1197_v41 }
 0xa6c   :  { %1654 = vmatpush3.msra.mxu0 %v1277_v63  ;;  %1655 = vmatprep.mubr.msk.f32.mxu0 %vm1723_vm1, %v1722_v5 }
 0xa73   :  { %1656 = vmatmul.mubr.msk.f32.vlgmr.msra.gmra.mrb[8].mxu0 %vm215_vm2, %v2084_v1  ;;  %v1731_v1 = vmov 0.0|0.0  }
 0xa74   :  { %1676 = vmatprep.subr.bf16.mxu1 %v1731_v1 }
 0xa75   :  { %1678 = vmatpush3.bf16.msra.mxu1 %v1677_v45 }
 0xa76   :  { %1679 = vmatprep.subr.bf16.mxu1 %v1731_v1 }
 0xad3   :  { %v1368_v43 = vpop.permute.xlu0 %1367 }
 0xb46   :  { %v1348_v34 = vpop.f32.mrb[8].mxu0 }
 0xb47   :  { %v1356_v20 = vmul.f32 %v1355_v42, %v1348_v34  ;;  %v1657_v40 = vpop.f32.mrb[9].mxu0 }
 0xb49   :  { %v1370_v44 = vadd.f32 %v1368_v43, %v1356_v20 }
 0xb4b   :  { %v1371_v46 = vsel %vm72_vm0, %v1370_v44, 0.0 }
 0xb4c   :  { %1372 = vadd.xlane.f32.xlu1 %v1371_v46 }
 0xbd9   :  { %v1373_v47 = vpop.xlane.xlu1 %1372 }
 0xbda   :  { %v1574_v48 = vmul.f32 -1.442695, %v1373_v47 }
 0xbdc   :  { %1717 = vpow2.f32 %v1574_v48 }
 0xbe6   :  { %v1718_v49 = vpop.eup %1717 }
 0xbe7   :  { %v1377_v52 = vadd.f32 1.0, %v1718_v49 }
 0xbe9   :  { %1719 = vrcp.f32 %v1377_v52 }
 0xbf3   :  { %v1720_v54 = vpop.eup %1719 }
 0xbf4   :  { %v1381_v55 = vsub.f32 1.0, %v1720_v54  ;;  %v1380_v22 = vmul.f32 %v1720_v54, %v2017_v59  ;;  %v1393_v59 = vld [vmem:[%s2194_s7 + $0x10] sm:$0xff] }
 0xbf6   :  { %v1382_v57 = vmul.f32 %v1381_v55, %v1348_v34 }
 0xbf8   :  { %1384 = vrot.lane.b32.xlu0 %v1382_v57, %s1729_s6 }
 0xc6a   :  { %v1385_v58 = vpop.permute.xlu0 %1384 }
 0xc6b   :  { %v1387_v60 = vadd.f32 %v1385_v58, %v1380_v22 }
 0xc6d   :  { %v1389_v62 = vmul.f32 0.01, %v1387_v60  ;;  %vm1388_vm13 = vcmp.ge.f32.partialorder %v1387_v60, 0.0 }
 0xc6f   :  { %v1390_v0 = vsel %vm1388_vm13, %v1387_v60, %v1389_v62 }
 0xc70   :  { %1399 = vrot.lane.b32.xlu0 %v1390_v0, %s1730_s0 }
 0xc74   :  { %1474 = vrot.lane.b32.xlu0 %v2002_v51, %s1727_s24  ;;  %v1683_v51 = vpack.c.bf16 %v1394_v14, %v1393_v59 }
 0xce2   :  { %v1400_v15 = vpop.permute.xlu0 %1399 }
 0xce3   :  { %1663 = vmatmul.mubr.msk.f32.vlgmr.msra.gmra.mrb[6].mxu1 %vm72_vm0, %v1400_v15 }
 0xce4   :  { %1681 = vmatpush3.bf16.msra.mxu1 %v1680_v53  ;;  %1673 = vmatprep.mubr.msk.f32.mxu1 %vm1723_vm1, %v1722_v5 }
 0xce5   :  { %1682 = vmatprep.subr.bf16.mxu1 %v1731_v1 }
 0xce6   :  { %v1475_v21 = vpop.permute.xlu0 %1474 }
 0xce8   :  { %1684 = vmatpush3.bf16.msra.mxu1 %v1683_v51 }
 0xceb   :  { %1674 = vmatmul.mubr.msk.f32.vlgmr.msra.gmra.mrb[8].mxu1 %vm300_vm3, %v1475_v21 }
 0xdb6   :  { %v1469_v10 = vpop.f32.mrb[6].mxu1 }
 0xdb7   :  { %v1664_v23 = vpop.f32.mrb[7].mxu1 }
 0xdbe   :  { %v1544_v50 = vpop.f32.mrb[8].mxu1 }
 0xdbf   :  { %v1545_v4 = vadd.f32 %v1544_v50, %v1469_v10  ;;  %v1675_v13 = vpop.f32.mrb[9].mxu1 }
 0xdc1   :  { %v1552_v16 = vadd.f32 %v1577_v24, %v1545_v4 }
 0xdc3   :  { %1554 = vst.msk [vmem:[%s2195_s8] sm:$0xff] %vm1553_vm14, %v1552_v16 }

</bundles_post_ra>
